<compile_context>
chip_gen: v7x
topology: tpu7x:2x2x1
jax: 0.10.0
libtpu: 0.0.40
codegen_flags: <defaults>
</compile_context>

<pallas_src>
import jax
import jax.numpy as jnp
from jax.experimental import pallas as pl
from jax.experimental.pallas import tpu as pltpu

_LANE = 128                      # lane-dense last dim (one full vreg lane width)
_TILE_BYTES = 2 * 1024 * 1024    # ~2 MiB per tile -> ~8 MiB with in+out double buffering


def _thresholded_relu_kernel(thr_ref, x_ref, o_ref):
    x = x_ref[...]
    t = thr_ref[0, 0].astype(x.dtype)   # cast to input dtype (matches PyTorch low-precision behavior)
    o_ref[...] = jnp.where(x > t, x, jnp.zeros_like(x))


def thresholded_relu(x, threshold=0.1):
    """Elementwise thresholded ReLU. x: any shape (NCHW expected), any float dtype."""
    orig_shape = x.shape
    orig_dtype = x.dtype
    n = x.size
    if n == 0:
        return x

    itemsize = jnp.dtype(orig_dtype).itemsize
    # Sublane packing multiple: f32 -> 8, bf16/f16 -> 16, int8/fp8 -> 32.
    packing = max(8, 32 // max(itemsize, 1))

    # Flatten into a lane-dense 2-D slab. With _LANE=128 padding is rarely
    # needed; when it is, it's at most 127 elements (one extra stream).
    flat = x.reshape(-1)
    padded_n = pl.cdiv(n, _LANE) * _LANE
    if padded_n != n:
        flat = jnp.pad(flat, (0, padded_n - n))
    rows = padded_n // _LANE
    x2d = flat.reshape(rows, _LANE)

    # ~2 MiB row tile (dtype-aware), rounded down to the packing multiple.
    tile_rows_cap = max(packing, (_TILE_BYTES // (_LANE * itemsize)) // packing * packing)

    if rows > tile_rows_cap:
        tr = tile_rows_cap
    elif rows > packing:
        # Split single-tile inputs into >=2 blocks so the "parallel" axis can
        # use both v7x TensorCores (harmless on single-TC v5e/v6e).
        tr = ((pl.cdiv(rows, 2) + packing - 1) // packing) * packing
    else:
        tr = rows  # full row extent (always a legal block shape)

    grid = (pl.cdiv(rows, tr),)

    # Runtime scalar threshold in SMEM -> no recompile per threshold value.
    thr = jnp.full((1, 1), threshold, dtype=jnp.float32)

    out2d = pl.pallas_call(
        _thresholded_relu_kernel,
        out_shape=jax.ShapeDtypeStruct((rows, _LANE), orig_dtype),
        grid=grid,
        in_specs=[
            pl.BlockSpec(memory_space=pltpu.MemorySpace.SMEM),
            pl.BlockSpec((tr, _LANE), lambda i: (i, 0)),
        ],
        out_specs=pl.BlockSpec((tr, _LANE), lambda i: (i, 0)),
        compiler_params=pltpu.CompilerParams(
            dimension_semantics=("parallel",),
        ),
    )(thr, x2d)

    out_flat = out2d.reshape(-1)
    if padded_n != n:
        out_flat = out_flat[:n]
    return out_flat.reshape(orig_shape)


if __name__ == "__main__":
    key = jax.random.PRNGKey(0)
    # NCHW input, small shape: batch=2, channels=4, spatial=16x16
    x = jax.random.normal(key, (2, 4, 16, 16), dtype=jnp.float32)

    threshold = 0.1
    y = thresholded_relu(x, threshold=threshold)
    y = jax.block_until_ready(y)

    # Reference check in plain JAX (matches PyTorch F.threshold(x, t, 0)).
    y_ref = jnp.where(x > threshold, x, 0.0)
    assert y.shape == x.shape and y.dtype == x.dtype
    assert jnp.allclose(y, y_ref), "mismatch vs reference"

    print("KERNEL_OK")
</pallas_src>

<mosaic_0001>
module attributes {stable_mosaic.version = 11 : i64} {
  func.func @_thresholded_relu_kernel(%arg0: i32, %arg1: memref<1x1xf32, #tpu.memory_space<smem>>, %arg2: memref<8x128xf32, #tpu.memory_space<vmem>>, %arg3: memref<8x128xf32, #tpu.memory_space<vmem>>) attributes {dimension_semantics = [#tpu.dimension_semantics<parallel>], iteration_bounds = array<i64: 2>, scalar_prefetch = 0 : i64, scratch_operands = 0 : i64, tpu.core_type = #tpu.core_type<tc>, window_params = [{transform_indices = @transform_0, window_bounds = array<i64: 1, 1>}, {transform_indices = @transform_1, window_bounds = array<i64: 8, 128>}, {transform_indices = @transform_2, window_bounds = array<i64: 8, 128>}]} {
    %c0 = arith.constant 0 : index
    %c0_0 = arith.constant 0 : index
    %0 = vector.load %arg2[%c0, %c0_0] : memref<8x128xf32, #tpu.memory_space<vmem>>, vector<8x128xf32>
    %c0_1 = arith.constant 0 : index
    %c0_2 = arith.constant 0 : index
    %1 = memref.load %arg1[%c0_1, %c0_2] : memref<1x1xf32, #tpu.memory_space<smem>>
    %2 = vector.broadcast %1 : f32 to vector<8x128xf32>
    %3 = arith.cmpf ogt, %0, %2 : vector<8x128xf32>
    %cst = arith.constant 0.000000e+00 : f32
    %4 = vector.broadcast %cst : f32 to vector<8x128xf32>
    %5 = arith.select %3, %0, %4 : vector<8x128xi1>, vector<8x128xf32>
    %c0_3 = arith.constant 0 : index
    %c0_4 = arith.constant 0 : index
    %6 = vector.load %arg3[%c0_3, %c0_4] : memref<8x128xf32, #tpu.memory_space<vmem>>, vector<8x128xf32>
    tpu.vector_store %arg3[%c0_3, %c0_4], %5 {strides = array<i32>} : memref<8x128xf32, #tpu.memory_space<vmem>>, vector<8x128xf32>,
    return
  }
  func.func @transform_0(%arg0: i32) -> (i32, i32) {
    %c0_i32 = arith.constant 0 : i32
    %c0_i32_0 = arith.constant 0 : i32
    %c0_i32_1 = arith.constant 0 : i32
    return %c0_i32, %c0_i32_0 : i32, i32
  }
  func.func @transform_1(%arg0: i32) -> (i32, i32) {
    %c0_i32 = arith.constant 0 : i32
    %c0_i32_0 = arith.constant 0 : i32
    return %arg0, %c0_i32 : i32, i32
  }
  func.func @transform_2(%arg0: i32) -> (i32, i32) {
    %c0_i32 = arith.constant 0 : i32
    %c0_i32_0 = arith.constant 0 : i32
    return %arg0, %c0_i32 : i32, i32
  }
}

</mosaic_0001>

<bundles_post_ra>
// kernel: tpu_custom_call.1
= control target key start
LH: loop header
LB: loop body
LE: loop exit
PB: predicated region body
PF: predicated region fallthrough
CT: control target
= control target key end

     0   :  { %s587_s0 = inlined_call_operand.<no memory space> [shape: f32[1,1], index: 0, kind: input, shape index: {}]   ;;  %s588_s1 = inlined_call_operand.hbm [shape: f32[16,128], index: 1, kind: input, shape index: {}]   ;;  %s589_s2 = inlined_call_operand.hbm [shape: f32[16,128], index: 2, kind: output, shape index: {}]  }
   0x1   :  { %7 = sst [smem:[#allocation2]] %s587_s0 }
   0x2   :  { %8 = vsyncpa [#allocation4], 0 }
   0x3   :  { %10 = vsyncpa [#allocation4 + $0x1], 0 }
   0x4   :  { %11 = vsyncpa [#allocation5], 0 }
   0x5   :  { %13 = vsyncpa [#allocation5 + $0x1], 0  ;;  %s426_s11 = smov 0   ;;  %s428_s12 = smov 0  }
   0x6   :  { %s430_s13 = smov 0   ;;  %s432_s14 = smov 0  }
   0x7 LB: > { %s447_s0 = sadd.s32 4294967295, %s404_s14   ;;  %s250_s15 = sadd.s32 4294967294, %s404_s14   ;;  %s404_s14 = sphi %s432_s14, %s604_s14   ;;  %s400_s13 = sphi %s430_s13, %s603_s13   ;;  %s396_s12 = sphi %s428_s12, %s602_s12   ;;  %s392_s11 = sphi %s426_s11, %s601_s11  }
   0x8   : > { %s451_s16 = sadd.s32 1, %s404_s14   ;;  %s47_s17 = sadd.s32 1, %s400_s13 }
   0x9   : > { %s44_s18 = ssub.s32 %s404_s14, %s451_s16  ;;  %p54_p0 = scmp.ne.s32.totalorder %s400_s13, %s396_s12 }
   0xa   : > { %p45_p1 = scmp.eq.s32.totalorder %s44_s18, 0  ;;  %p55_p2 = scmp.eq.s32.totalorder %s404_s14, 0 }
   0xb   : > { %p60_p3 = scmp.ne.s32.totalorder %s396_s12, %s392_s11  ;;  %p61_p4 = scmp.eq.s32.totalorder %s447_s0, 0 }
   0xc   : > { %s463_s19 = scalar_select %p45_p1, %s400_s13, %s47_s17  }
   0xd   : > { %p465_p5 = por %p55_p2, %p54_p0  ;;  %p469_p6 = por %p61_p4, %p60_p3 }
   0xe   : > { %p84_p7 = scmp.eq.s32.totalorder %s447_s0, 1  ;;  %p90_p8 = scmp.eq.s32.totalorder %s250_s15, 1 }
   0xf   : > { %p274_p10 = scmp.lt.s32.totalorder %s404_s14, 2  ;;  %s113_s24 = sand.u32 1, %s400_s13  }
  0x10   : > { %p476_p11 = por %p84_p7, %p54_p0  ;;  %p480_p12 = por %p90_p8, %p60_p3 }
  0x11   : > { %s254_s25 = sshll.u32 %s404_s14, 7  ;;  %s253_s26 = sshll.u32 %s113_s24, 3 }
  0x12   : > { %s593_s22 = scalar_select %p476_p11, 1, 0 }
  0x13   : > { %s594_s23 = scalar_select %p480_p12, 1, 0 }
  0x14   : > { %s489_s29 = scalar_lea.hbm %s588_s1, %s254_s25  ;;  %s117_s30 = scalar_lea.vmem [#allocation3], %s253_s26 }
  0x15   : > { %s124_s3 = sshll.u32 %s117_s30, 4  ;;  %p493_p13 = pnand %p274_p10, %p465_p5  ;;  %s497_s3 = int_to_ptr.vmem [resolvable:$true] %s124_s3 }
  0x16   : > { %s114_s5 = scalar_lea.sflag [#allocation4], %s113_s24  ;;  %s308_s6 = scalar_lea.hbm %s489_s29, 128 }
  0x17   : > { %p309_p2 = scmp.ne.s32.totalorder %s489_s29, %s308_s6  ;;  %p310_p3 = pneg %p493_p13 }
  0x18   : > { %s313_s9 = scalar_lea.hbm %s588_s1, 256  ;;  %p314_p5 = scmp.lt.u32.totalorder %s489_s29, %s588_s1 }
  0x19   : > { %p311_p4 = pnand %p310_p3, %p309_p2  ;;  %p315_p8 = scmp.lt.u32.totalorder %s313_s9, %s308_s6 }
  0x1a   : > { %p317_p9 = scmp.lt.u32.totalorder %s308_s6, %s489_s29 }
  0x1b   : > { %p312_p7 = pneg %p311_p4  ;;  %p316_p10 = por %p315_p8, %p314_p5 }
  0x1d   : > { %p318_p0 = por %p317_p9, %p316_p10 }
  0x1f   : > { %p319_p1 = pnand %p318_p0, %p312_p7 }
  0x21   : > { %322 = shalt.err (!%p319_p1)
}
  0x22   : > { %s323_s17 = scalar_lea.vmem %s497_s3, 128  ;;  %s406_s18 = smov [#allocation3]  }
  0x23   : > { %p324_p2 = scmp.ne.s32.totalorder %s497_s3, %s323_s17  ;;  %s328_s20 = sshll.u32 %s406_s18, 4  ;;  %s329_s20 = int_to_ptr.vmem [resolvable:$false] %s328_s20 }
  0x24   : > { %s330_s24 = scalar_lea.vmem %s329_s20, 256  ;;  %p331_p11 = scmp.lt.s32.totalorder %s497_s3, %s329_s20 }
  0x25   : > { %p326_p4 = pnand %p324_p2, %p310_p3  ;;  %p332_p5 = scmp.lt.s32.totalorder %s330_s24, %s323_s17 }
  0x27   : > { %p327_p12 = pneg %p326_p4  ;;  %p333_p8 = por %p332_p5, %p331_p11 }
  0x29   : > { %p334_p9 = pnand %p333_p8, %p327_p12 }
  0x2b   : > { %337 = shalt.err (!%p334_p9)
}
  0x2c   : > { %269 = dma.hbm_to_vmem [thread:$0]  (!%p493_p13), %s489_s29, 128, %s497_s3, %s114_s5  }
  0x2d   : > { %p596_p0 = scmp.lt.s32.totalorder %s404_s14, 3  ;;  %p597_p1 = scmp.ge.s32.totalorder %s404_s14, 1 }
  0x2f   : > { %p130_p3 = pnand %p597_p1, %p596_p0 }
  0x30   : > { %s531_s25 = sand.u32 (!%p130_p3), 1, %s396_s12  }
  0x31   : > { %133 = sbr.rel (%p130_p3) target bundleno = 83 (0x53), region = 28  ;;  %s256_s26 = sshll.u32 (!%p130_p3), %s531_s25, 3 }
  0x32   : > { %s136_s27 = scalar_lea.sflag (!%p130_p3), [#allocation4], %s531_s25  ;;  %s139_s28 = scalar_lea.vmem (!%p130_p3), [#allocation3], %s256_s26 }
  0x38   : > { %383 = dma.done.wait (%p469_p6), %s136_s27, 128  }
  0x39   : > { %385 = vsyncadd (%p469_p6), %s136_s27, 4294967168  ;;  %s161_s29 = sld [smem:[#allocation2]]  ;;  %s159_s30 = scalar_lea.vmem [#allocation6], %s256_s26  ;;  %v160_v0 = vld [vmem:[%s139_s28] sm:$0xff] }
  0x3a   : > { %s180_s3 = sshll.u32 %s159_s30, 4  ;;  %s259_s4 = sshll.u32 %s447_s0, 7  ;;  %s540_s3 = int_to_ptr.vmem [resolvable:$true] %s180_s3 }
  0x3b   : > { %s545_s21 = scalar_lea.hbm %s589_s2, %s259_s4  ;;  %s167_s7 = scalar_lea.sflag [#allocation5], %s531_s25 }
  0x3c   : > { %s338_s8 = scalar_lea.vmem %s540_s3, 128  ;;  %p598_p11 = scmp.ne.s32.totalorder %s593_s22, 0 }
  0x3d   : > { %p339_p6 = scmp.ne.s32.totalorder %s540_s3, %s338_s8  ;;  %s407_s0 = smov [#allocation6]  }
  0x3e   : > { %s342_s9 = sshll.u32 %s407_s0, 4  ;;  %s343_s9 = int_to_ptr.vmem [resolvable:$false] %s342_s9 }
  0x3f   : > { %v162_v1 = vstv %s161_s29  ;;  %p340_p12 = pnand %p339_p6, %p598_p11  ;;  %s344_s10 = scalar_lea.vmem %s343_s9, 256 }
  0x40   : > { %vm163_vm0 = vcmp.gt.f32.partialorder %v160_v0, %v162_v1  ;;  %p345_p7 = scmp.lt.s32.totalorder %s540_s3, %s343_s9  ;;  %p346_p10 = scmp.lt.s32.totalorder %s344_s10, %s338_s8 }
  0x41   : > { %v164_v2 = vsel %vm163_vm0, %v160_v0, 0.0  ;;  %p341_p13 = pneg %p340_p12 }
  0x42   : > { %165 = vst [vmem:[%s159_s30] sm:$0xff] %v164_v2  ;;  %p347_p2 = por %p346_p10, %p345_p7 }
  0x44   : > { %p348_p4 = pnand %p347_p2, %p341_p13 }
  0x46   : > { %351 = shalt.err (!%p348_p4)
}
  0x47   : > { %s352_s15 = scalar_lea.hbm %s545_s21, 128  ;;  %s356_s20 = scalar_lea.hbm %s589_s2, 256 }
  0x48   : > { %p353_p5 = scmp.ne.s32.totalorder %s545_s21, %s352_s15  ;;  %p357_p0 = scmp.lt.u32.totalorder %s545_s21, %s589_s2 }
  0x49   : > { %p358_p1 = scmp.lt.u32.totalorder %s356_s20, %s352_s15  ;;  %p360_p6 = scmp.lt.u32.totalorder %s352_s15, %s545_s21 }
  0x4a   : > { %p354_p8 = pnand %p353_p5, %p598_p11 }
  0x4b   : > { %p359_p3 = por %p358_p1, %p357_p0 }
  0x4c   : > { %p355_p9 = pneg %p354_p8 }
  0x4d   : > { %p361_p12 = por %p360_p6, %p359_p3 }
  0x4f   : > { %p362_p13 = pnand %p361_p12, %p355_p9 }
  0x51   : > { %365 = shalt.err (!%p362_p13)
}
  0x52   : > { %264 = dma.vmem_to_hbm [thread:$0]  (%p598_p11), %s540_s3, 128, %s545_s21, %s167_s7  }
  0x53 PF: > { %s192_s26 = sand.u32 1, %s392_s11   ;;  %p599_p7 = scmp.ne.s32.totalorder %s594_s23, 0 }
  0x54   : > { %p600_p10 = scmp.ge.s32.totalorder %s404_s14, 2  ;;  %s193_s27 = scalar_lea.sflag [#allocation5], %s192_s26 }
  0x56   : > { %p271_p2 = pnand %p600_p10, %p599_p7 }
  0x58   : > { %387 = dma.done.wait (!%p271_p2), %s193_s27, 128  }
  0x59   : > { %389 = vsyncadd (!%p271_p2), %s193_s27, 4294967168  ;;  %p16_p4 = scmp.ge.s32.totalorder %s451_s16, 4   ;;  %s601_s11 = smov %s396_s12 }
  0x5a   : > { %s602_s12 = smov %s400_s13  ;;  %s603_s13 = smov %s463_s19 }
  0x5b   : > { %s604_s14 = smov %s451_s16  ;;  %18 = sbr.rel (!%p16_p4) target bundleno = 7 (0x7), region = 73 }
  0x62   :  { %198 = vsyncpa [#allocation4], 1 }
  0x63   :  { %200 = vsyncpa [#allocation4 + $0x1], 1 }
  0x64   :  { %201 = vsyncpa [#allocation5], 1 }
  0x65   :  { %203 = vsyncpa [#allocation5 + $0x1], 1 }

</bundles_post_ra>
